<compile_context>
chip_gen: v5e
topology: v5e:2x2
jax: 0.10.0
libtpu: 0.0.40
codegen_flags: <defaults>
</compile_context>

<pallas_src>
import math

import jax
import jax.numpy as jnp
from jax.experimental import pallas as pl
from jax.experimental.pallas import tpu as pltpu


def _round_up(x: int, m: int) -> int:
    return ((x + m - 1) // m) * m


def _projection_kernel(x_ref, w_ref, b_ref, o_ref):
    # x_ref: (tm, H)  row tile of sequence representations (compute dtype)
    # w_ref: (H, vt)  K-major vocab tile of the item-embedding matrix
    # b_ref: (1, vt)  bias tile (f32)
    # o_ref: (tm, vt) logits tile (out dtype)
    acc = jnp.dot(x_ref[...], w_ref[...], preferred_element_type=jnp.float32)
    o_ref[...] = (acc + b_ref[...]).astype(o_ref.dtype)


def prepare_projection_params(emb_weight, output_bias, *, compute_dtype=jnp.bfloat16):
    """One-time parameter prep (do this once, outside the per-call path).

    emb_weight: (V, H) -> pre-transposed, pre-cast (H, V) compute_dtype
    output_bias: (V,)  -> (1, V) f32
    """
    w_hv = jnp.asarray(emb_weight).T.astype(compute_dtype)
    bias2d = jnp.asarray(output_bias).reshape(1, -1).astype(jnp.float32)
    return w_hv, bias2d


def _vmem_capacity_bytes() -> int:
    try:
        return int(pltpu.get_tpu_info().vmem_capacity_bytes)
    except Exception:
        return 64 << 20  # conservative: v7x per-TensorCore VMEM


def _tile_need_bytes(tm: int, vt: int, H: int, cbytes: int, obytes: int) -> int:
    # Double-buffered X / W / out tiles + (sublane-padded) bias tile.
    return (
        2 * tm * H * cbytes
        + 2 * H * vt * cbytes
        + 2 * tm * vt * obytes
        + 2 * 8 * _round_up(vt, 128) * 4
    )


def item_embedding_projection(
    representation,
    w_hv,
    bias2d,
    *,
    tm: int = 2048,
    vt: int = 1024,
    out_dtype=jnp.bfloat16,
):
    """representation: (N, S, H); w_hv: (H, V) pre-transposed weight;
    bias2d: (1, V) f32  ->  logits (N, S, V) in out_dtype."""
    N, S, H = representation.shape
    Hw, V = w_hv.shape
    assert H == Hw, "sequence representation size must equal item embedding size"

    M = N * S
    compute_dtype = w_hv.dtype
    cbytes = jnp.dtype(compute_dtype).itemsize
    obytes = jnp.dtype(out_dtype).itemsize

    # Cast the activations once (bf16 halves X HBM traffic; MXU-native).
    x2d = representation.reshape(M, H).astype(compute_dtype)

    # Clamp tiles to the (rounded-up) problem size, respecting the
    # (sublane, lane) tiling rules: bf16 second-minor % 16, lanes % 128.
    tm = min(tm, _round_up(M, 16))
    vt = min(vt, _round_up(V, 128))

    # Generation-aware tile selection: fit ~75% of physical VMEM
    # (~48 MiB on v7x, ~96 MiB on v5e/v6e).  Shrink tiles, don't just clamp.
    cap = _vmem_capacity_bytes()
    budget = (3 * cap) // 4
    while _tile_need_bytes(tm, vt, H, cbytes, obytes) > budget:
        if tm > 512:
            tm = _round_up(tm // 2, 16)
        elif vt > 512:
            vt = _round_up(vt // 2, 128)
        elif tm > 64:
            tm = _round_up(tm // 2, 16)
        elif vt > 128:
            vt = _round_up(vt // 2, 128)
        else:
            break  # TODO(synk): tile the contraction dim H for extremely large hidden sizes.

    need = _tile_need_bytes(tm, vt, H, cbytes, obytes)
    vmem_limit = min(cap - (8 << 20), max(need + (8 << 20), 32 << 20))

    # Ragged edges (M % tm, V % vt) are handled by Pallas with masked edge
    # blocks: only M / V are ragged, never the contraction dim H, so garbage
    # edge lanes only feed output elements that are never written back.
    grid = (pl.cdiv(M, tm), pl.cdiv(V, vt))

    out2d = pl.pallas_call(
        _projection_kernel,
        out_shape=jax.ShapeDtypeStruct((M, V), out_dtype),
        grid_spec=pltpu.PrefetchScalarGridSpec(
            num_scalar_prefetch=0,
            grid=grid,
            in_specs=[
                # X row tile: independent of the inner vocab axis -> resident
                # while the embedding weight streams.
                pl.BlockSpec((tm, H), lambda i, j: (i, 0)),
                # K-major weight tile (H, vt): MXU-natural, lane-dense.
                pl.BlockSpec((H, vt), lambda i, j: (0, j)),
                # Bias vocab tile (tiny per-step DMA; kept per-tile so ragged V
                # never reads out of bounds).
                pl.BlockSpec((1, vt), lambda i, j: (0, j)),
            ],
            out_specs=pl.BlockSpec((tm, vt), lambda i, j: (i, j)),
        ),
        compiler_params=pltpu.CompilerParams(
            dimension_semantics=("parallel", "parallel"),
            vmem_limit_bytes=int(vmem_limit),
        ),
    )(x2d, w_hv, bias2d)

    return out2d.reshape(N, S, V)


def item_embedding_projection_layer(
    representation, emb_weight, output_bias, *, compute_dtype=jnp.bfloat16, **kwargs
):
    """Convenience one-call forward matching the PyTorch module signature
    (prefer caching prepare_projection_params() across calls)."""
    w_hv, bias2d = prepare_projection_params(
        emb_weight, output_bias, compute_dtype=compute_dtype
    )
    return item_embedding_projection(representation, w_hv, bias2d, **kwargs)


if __name__ == "__main__":
    # Small, module-consistent shapes: batch=2, seq=8, hidden=32, vocab=256.
    N, S, H, V = 2, 8, 32, 256

    key = jax.random.PRNGKey(0)
    k_rep, k_emb, k_bias = jax.random.split(key, 3)

    representation = jax.random.normal(k_rep, (N, S, H), dtype=jnp.float32)

    # Deterministic parameter init mirroring the module:
    #   embedding.weight ~ N(0, 1) (nn.Embedding default)
    #   output_bias ~ U(-1/sqrt(V), 1/sqrt(V))
    emb_weight = jax.random.normal(k_emb, (V, H), dtype=jnp.float32)
    bound = 1.0 / math.sqrt(V)
    output_bias = jax.random.uniform(
        k_bias, (V,), dtype=jnp.float32, minval=-bound, maxval=bound
    )

    # One-time prep (pre-transpose + pre-cast the embedding matrix), then run.
    w_hv, bias2d = prepare_projection_params(emb_weight, output_bias)
    out = item_embedding_projection(representation, w_hv, bias2d)
    out = jax.block_until_ready(out)

    assert out.shape == (N, S, V)
    assert out.dtype == jnp.bfloat16

    # Reference with the same numerics as the kernel (bf16 operands, f32
    # accumulation, f32 bias); kernel only adds one bf16 rounding of logits.
    ref = (
        jnp.einsum(
            "nsh,vh->nsv",
            representation.astype(jnp.bfloat16),
            emb_weight.astype(jnp.bfloat16),
            preferred_element_type=jnp.float32,
        )
        + output_bias
    )
    assert jnp.allclose(out.astype(jnp.float32), ref, atol=8e-2, rtol=2e-2)

    # Loose sanity check against pure-f32 math (bf16 rounding only).
    ref_f32 = jnp.einsum("nsh,vh->nsv", representation, emb_weight) + output_bias
    assert jnp.allclose(out.astype(jnp.float32), ref_f32, atol=0.25, rtol=0.05)

    print("KERNEL_OK")
</pallas_src>

<mosaic_0001>
module attributes {stable_mosaic.version = 11 : i64} {
  func.func @_projection_kernel(%arg0: i32, %arg1: i32, %arg2: memref<16x32xbf16, #tpu.memory_space<vmem>>, %arg3: memref<32x256xbf16, #tpu.memory_space<vmem>>, %arg4: memref<1x256xf32, #tpu.memory_space<vmem>>, %arg5: memref<16x256xbf16, #tpu.memory_space<vmem>>) attributes {dimension_semantics = [#tpu.dimension_semantics<parallel>, #tpu.dimension_semantics<parallel>], iteration_bounds = array<i64: 1, 1>, scalar_prefetch = 0 : i64, scratch_operands = 0 : i64, tpu.core_type = #tpu.core_type<tc>, window_params = [{transform_indices = @transform_0, window_bounds = array<i64: 16, 32>}, {transform_indices = @transform_1, window_bounds = array<i64: 32, 256>}, {transform_indices = @transform_2, window_bounds = array<i64: 1, 256>}, {transform_indices = @transform_3, window_bounds = array<i64: 16, 256>}]} {
    %c0 = arith.constant 0 : index
    %c0_0 = arith.constant 0 : index
    %0 = vector.load %arg2[%c0, %c0_0] : memref<16x32xbf16, #tpu.memory_space<vmem>>, vector<16x32xbf16>
    %c0_1 = arith.constant 0 : index
    %c0_2 = arith.constant 0 : index
    %1 = vector.load %arg3[%c0_1, %c0_2] : memref<32x256xbf16, #tpu.memory_space<vmem>>, vector<32x256xbf16>
    %cst = arith.constant dense<0.000000e+00> : vector<16x256xf32>
    %2 = tpu.matmul %0, %1, %cst {dimension_numbers = #tpu.dot_dimension_numbers<[1], [0], [0], [1], [0, 0, 1, 1], [], []>} : vector<16x32xbf16>, vector<32x256xbf16>, vector<16x256xf32> -> vector<16x256xf32>
    %c0_3 = arith.constant 0 : index
    %c0_4 = arith.constant 0 : index
    %3 = vector.load %arg4[%c0_3, %c0_4] : memref<1x256xf32, #tpu.memory_space<vmem>>, vector<1x256xf32>
    %4 = vector.broadcast %3 : vector<1x256xf32> to vector<16x256xf32>
    %5 = arith.addf %2, %4 : vector<16x256xf32>
    %6 = arith.truncf %5 : vector<16x256xf32> to vector<16x256xbf16>
    %c0_5 = arith.constant 0 : index
    %c0_6 = arith.constant 0 : index
    %7 = vector.load %arg5[%c0_5, %c0_6] : memref<16x256xbf16, #tpu.memory_space<vmem>>, vector<16x256xbf16>
    tpu.vector_store %arg5[%c0_5, %c0_6], %6 {strides = array<i32>} : memref<16x256xbf16, #tpu.memory_space<vmem>>, vector<16x256xbf16>,
    return
  }
  func.func @transform_0(%arg0: i32, %arg1: i32) -> (i32, i32) {
    %c0_i32 = arith.constant 0 : i32
    %c0_i32_0 = arith.constant 0 : i32
    return %arg0, %c0_i32 : i32, i32
  }
  func.func @transform_1(%arg0: i32, %arg1: i32) -> (i32, i32) {
    %c0_i32 = arith.constant 0 : i32
    %c0_i32_0 = arith.constant 0 : i32
    return %c0_i32, %arg1 : i32, i32
  }
  func.func @transform_2(%arg0: i32, %arg1: i32) -> (i32, i32) {
    %c0_i32 = arith.constant 0 : i32
    %c0_i32_0 = arith.constant 0 : i32
    return %c0_i32, %arg1 : i32, i32
  }
  func.func @transform_3(%arg0: i32, %arg1: i32) -> (i32, i32) {
    %c0_i32 = arith.constant 0 : i32
    return %arg0, %arg1 : i32, i32
  }
}

</mosaic_0001>

<bundles_post_ra>
// kernel: tpu_custom_call.1
= control target key start
LH: loop header
LB: loop body
LE: loop exit
PB: predicated region body
PF: predicated region fallthrough
CT: control target
= control target key end

     0   :  { %8 = vsyncpa [#allocation3], 0  ;;  %s337_s0 = inlined_call_operand.hbm [shape: bf16[16,32], index: 0, kind: input, shape index: {}]   ;;  %s338_s1 = inlined_call_operand.hbm [shape: bf16[32,256], index: 1, kind: input, shape index: {}]   ;;  %s339_s2 = inlined_call_operand.hbm [shape: f32[1,256], index: 2, kind: input, shape index: {}]   ;;  %s340_s3 = inlined_call_operand.hbm [shape: bf16[16,256], index: 3, kind: output, shape index: {}]  }
   0x1   :  { %9 = vsyncpa [#allocation6], 0  ;;  %s28_s14 = sshll.u32 %s338_s1, 4  ;;  %s29_s14 = int_to_ptr.hbm [resolvable:$true] %s28_s14 }
   0x2   :  { %10 = vsyncpa [#allocation4], 0  ;;  %s291_s15 = smov [#allocation5]   ;;  %s15_s19 = sshll.u32 %s337_s0, 4  ;;  %s16_s19 = int_to_ptr.hbm [resolvable:$true] %s15_s19 }
   0x3   :  { %s30_s16 = sshll.u32 %s291_s15, 4  ;;  %s292_s20 = smov 128   ;;  %s31_s16 = int_to_ptr.vmem [resolvable:$true] %s30_s16 }
   0x4   :  { %s293_s21 = smov 8   ;;  %s294_s22 = smov [#allocation2]  }
   0x5   :  { %36 = dma.hbm_to_vmem [thread:$0]  %s29_s14, 512, %s31_s16, [#allocation6], %s292_s20, %s292_s20, %s293_s21  }
   0x6   :  { %s17_s23 = sshll.u32 %s294_s22, 4  ;;  %s295_s1 = smov 64   ;;  %s18_s23 = int_to_ptr.vmem [resolvable:$true] %s17_s23 }
   0x7   :  { %s296_s24 = smov 4   ;;  %s42_s27 = sshll.u32 %s339_s2, 4  ;;  %s43_s27 = int_to_ptr.hbm [resolvable:$true] %s42_s27 }
   0x8   :  { %23 = dma.hbm_to_vmem [thread:$0]  %s16_s19, 128, %s18_s23, [#allocation3], %s295_s1, %s295_s1, %s296_s24  }
   0x9   :  { %s297_s28 = smov [#allocation7]  }
   0xa   :  { %s44_s0 = sshll.u32 %s297_s28, 4  ;;  %s45_s0 = int_to_ptr.vmem [resolvable:$true] %s44_s0 }
   0xb   :  { %47 = dma.hbm_to_vmem [thread:$0]  %s43_s27, 32, %s45_s0, [#allocation6]  }
   0xc   :  { %285 = dma.done.wait [#allocation3], 128  }
   0xd   :  { %286 = vsyncadd [#allocation3], 4294967168 }
   0xe   :  { %287 = dma.done.wait [#allocation6], 544  }
   0xf   :  { %288 = vsyncadd [#allocation6], 4294966752  ;;  %v168_v0 = vld [vmem:[#allocation5 + $0x10] sm:$0xf]  ;;  %v180_v1 = vld [vmem:[#allocation5 + $0x14] sm:$0xf0] }
  0x10   :  { %v179_v2 = vld [vmem:[#allocation5 + $0x14] sm:$0xf]  ;;  %v169_v3 = vor.u32 %v180_v1, %v168_v0  ;;  %v170_v4 = vld [vmem:[#allocation5 + $0x18] sm:$0xf0]  ;;  %v160_v5 = vld [vmem:[#allocation5] sm:$0xf] }
  0x11   :  { %v178_v6 = vld [vmem:[#allocation5 + $0x4] sm:$0xf0]  ;;  %v173_v7 = vor.u32 %v179_v2, %v170_v4  ;;  %v177_v8 = vld [vmem:[#allocation5 + $0x4] sm:$0xf]  ;;  %v162_v9 = vld [vmem:[#allocation5 + $0x8] sm:$0xf0] }
  0x12   :  { %108 = vmatpush.bf16.msra.mxu0 %v169_v3  ;;  %v161_v10 = vor.u32 %v178_v6, %v160_v5  ;;  %v165_v11 = vor.u32 %v177_v8, %v162_v9  ;;  %v176_v12 = vld [vmem:[#allocation2] sm:$0xff]  ;;  %vm98_vm0 = vcmask 261120   ;;  %v67_v13 = vld [vmem:[#allocation7] sm:$0x3]  ;;  %s298_s2 = smov [#allocation8]   ;;  %s140_s5 = sshll.u32 %s340_s3, 4  ;;  %s141_s5 = int_to_ptr.hbm [resolvable:$true] %s140_s5 }
  0x13   :  { %122 = vmatpush.bf16.msra.mxu1 %v173_v7  ;;  %v69_v14 = vperm.slane %v67_v13, 0  ;;  %v70_v15 = vperm.slane %v67_v13, 1  ;;  %s138_s29 = sshll.u32 %s298_s2, 4  ;;  %s139_s29 = int_to_ptr.vmem [resolvable:$true] %s138_s29 }
  0x16   :  { %109 = vmatpush.bf16.msra.mxu0 %v161_v10 }
  0x17   :  { %123 = vmatpush.bf16.msra.mxu1 %v165_v11 }
  0x19   :  { %174 = vmatmul.msk.bf16.vlgmr.msra.gmra.mxu0 %vm98_vm0, %v176_v12 }
  0x1a   :  { %175 = vmatmul.msk.bf16.vlgmr.msra.gmra.mxu1 %vm98_vm0, %v176_v12 }
  0x96   :  { %v111_v16 = vpop.f32.mrf.mxu0 }
  0x97   :  { %v112_v17 = vadd.f32 %v111_v16, %v69_v14  ;;  %v125_v18 = vpop.f32.mrf.mxu1 }
  0x98   :  { %v126_v19 = vadd.f32 %v125_v18, %v70_v15 }
  0x9a   :  { %v130_v20 = vpack.c.bf16 %v126_v19, %v112_v17 }
  0x9c   :  { %132 = vst [vmem:[#allocation8] sm:$0xff] %v130_v20 }
  0x9e   :  { %v113_v21 = vpop.f32.mrf.mxu0 }
  0x9f   :  { %v114_v22 = vadd.f32 %v113_v21, %v69_v14  ;;  %v127_v23 = vpop.f32.mrf.mxu1 }
  0xa0   :  { %v128_v24 = vadd.f32 %v127_v23, %v70_v15 }
  0xa2   :  { %v131_v25 = vpack.c.bf16 %v128_v24, %v114_v22 }
  0xa4   :  { %133 = vst [vmem:[#allocation8 + $0x8] sm:$0xff] %v131_v25 }
  0xa5   :  { %146 = dma.vmem_to_hbm [thread:$0]  %s139_s29, 256, %s141_s5, [#allocation4], %s292_s20, %s292_s20, %s293_s21  }
  0xa6   :  { %289 = dma.done.wait [#allocation4], 256  }
  0xa7   :  { %290 = vsyncadd [#allocation4], 4294967040 }
  0xa8   :  { %151 = vsyncpa [#allocation3], 1 }
  0xa9   :  { %152 = vsyncpa [#allocation6], 1 }
  0xaa   :  { %153 = vsyncpa [#allocation4], 1 }

</bundles_post_ra>
